<compile_context>
chip_gen: v7x
topology: tpu7x:2x2x1
jax: 0.10.0
libtpu: 0.0.40
codegen_flags: <defaults>
</compile_context>

<pallas_src>
import functools

import jax
import jax.numpy as jnp
from jax.experimental import pallas as pl
from jax.experimental.pallas import tpu as pltpu


# ---------------------------------------------------------------------------
# Hardware caps / tiling policy
# ---------------------------------------------------------------------------
def _device_caps():
    """Returns (physical_vmem_bytes, num_tensorcores) with safe fallbacks."""
    try:
        kind = (getattr(jax.devices()[0], "device_kind", "") or "").lower()
    except Exception:
        kind = ""
    num_tc = 2 if ("v7" in kind or "v4" in kind or "v5p" in kind) else 1
    vmem = None
    try:
        info = pltpu.get_tpu_info()
        v = getattr(info, "vmem_capacity_bytes", None)
        if v:
            vmem = int(v)
    except Exception:
        vmem = None
    if not vmem:
        vmem = (128 << 20) if ("v5 lite" in kind or "v5e" in kind or "v6" in kind) else (64 << 20)
    return vmem, num_tc


def _round_up(x, m):
    return ((x + m - 1) // m) * m


def _clamp_vmem(needed, cap):
    return int(min(max(needed, 32 << 20), cap))


def _choose_tiles(B, C, HW, itemsize, num_tc, target_block_bytes):
    """Pick (bt, hwt, cw, n_split, nk, nkk) for the tiled two-pass path."""
    if HW < 128:
        hwt = HW          # full (small) spatial extent on lanes, no masking needed
        cw = HW
    else:
        cw = 128
        budget_lanes = max(128, ((target_block_bytes // (C * itemsize)) // 128) * 128)
        hwt = min(_round_up(HW, 128), budget_lanes, cw * 256)   # cap unrolled chunk loop
        # If the batch axis can't feed every TensorCore, make sure there are at
        # least num_tc HW blocks so the reduction itself can be split per core.
        if num_tc > 1 and B < num_tc and HW >= 128 * num_tc:
            hwt = min(hwt, max(128, _round_up(pl.cdiv(HW, num_tc), 128)))
    nkk = pl.cdiv(HW, hwt)    # total HW blocks

    # Batch tile: largest divisor of B whose block (plus the f32 accumulator)
    # fits the budget.  On multi-TC chips keep the number of batch blocks a
    # multiple of the core count so megacore sharding stays balanced; on
    # single-TC chips just pack as much batch as fits.
    per_sample = C * (hwt * itemsize + cw * 4)
    bt = 1
    for d in range(1, B + 1):
        if B % d:
            continue
        if d * per_sample > target_block_bytes:
            continue
        nb_cand = B // d
        if num_tc > 1 and B >= num_tc and nb_cand % num_tc != 0:
            continue
        bt = d
    nb = B // bt

    # Split the HW reduction across cores when batch blocks can't feed them.
    n_split = 1
    if num_tc > 1 and nb < num_tc and nkk >= num_tc:
        n_split = num_tc
    nk = pl.cdiv(nkk, n_split)
    return bt, hwt, cw, n_split, nk, nkk


# ---------------------------------------------------------------------------
# Kernels
# ---------------------------------------------------------------------------
def _pool_kernel(x_ref, o_ref, acc_ref, *, hwt, cw, hw, nk, needs_mask):
    """Per-(b, c) spatial sums; grid = (batch, hw_split, hw_steps)."""
    s = pl.program_id(1)
    k = pl.program_id(2)

    @pl.when(k == 0)
    def _():
        acc_ref[...] = jnp.zeros_like(acc_ref)

    bt, ch, _ = acc_ref.shape
    if needs_mask:
        lane = jax.lax.broadcasted_iota(jnp.int32, (bt, ch, cw), 2)
        limit = hw - (s * nk + k) * hwt   # may be <= 0 for fully out-of-bounds blocks

    # Lane-dense VPU accumulation: fold the hwt lanes down to cw with 128-wide
    # element-wise adds (no per-step cross-lane XLU reduce, no full f32 temp).
    part = None
    for i in range(hwt // cw):
        chunk = x_ref[:, :, i * cw:(i + 1) * cw].astype(jnp.float32)
        if needs_mask:
            chunk = jnp.where(lane < (limit - i * cw), chunk, 0.0)
        part = chunk if part is None else part + chunk
    acc_ref[...] += part

    @pl.when(k == nk - 1)
    def _():
        # One cross-lane (XLU) reduce per output block; raw sums, scaled in XLA.
        o_ref[...] = jnp.sum(acc_ref[...], axis=-1, keepdims=True)[None]


def _broadcast_kernel(g_ref, o_ref):
    """Expand the (bt, C, 1) gate over the HW lane axis (pure lane splat)."""
    o_ref[...] = jnp.broadcast_to(g_ref[...], o_ref.shape).astype(o_ref.dtype)


def _fused_kernel(x_ref, *rest, inv_hw):
    """Pool + folded-BN MLP + broadcast for one batch block (small inputs)."""
    o_ref = rest[-1]
    wb_refs = rest[:-1]
    h = jnp.sum(x_ref[...].astype(jnp.float32), axis=-1) * inv_hw   # (bt, C)
    n_layers = len(wb_refs) // 2
    for li in range(n_layers):
        w = wb_refs[2 * li][...]
        b = wb_refs[2 * li + 1][...]                                # (1, out)
        h = jnp.dot(h, w, preferred_element_type=jnp.float32) + b
        if li < n_layers - 1:
            h = jnp.maximum(h, 0.0)
    gate = h.astype(o_ref.dtype)                                    # (bt, C)
    o_ref[...] = jnp.broadcast_to(gate[:, :, None], o_ref.shape)


# ---------------------------------------------------------------------------
# BatchNorm folding (eval mode)
# ---------------------------------------------------------------------------
def _fold_bn(params, eps):
    """Fold eval-mode BatchNorm1d into the preceding Linear (f32 weights)."""
    layers = []
    for (w, b, gamma, beta, rm, rv) in params["hidden"]:
        s = gamma / jnp.sqrt(rv + eps)
        layers.append((w * s[None, :], b * s + beta - rm * s))
    layers.append((params["last_w"], params["last_b"]))
    return [(w.astype(jnp.float32), b.astype(jnp.float32)) for (w, b) in layers]


# ---------------------------------------------------------------------------
# Fused small-input path (one pallas_call)
# ---------------------------------------------------------------------------
def _fused_forward(x3, layers, B, C, HW, itemsize, num_tc, vmem_cap):
    per_sample = C * HW * max(itemsize, 4) * 2
    bt = 1
    for d in range(1, B + 1):
        if B % d:
            continue
        if d * per_sample > (8 << 20):
            continue
        nb_cand = B // d
        if num_tc > 1 and B >= num_tc and nb_cand % num_tc != 0:
            continue
        bt = d
    nb = B // bt

    wb, w_specs, w_bytes = [], [], 0
    for (w, b) in layers:
        b2 = b.reshape(1, -1)
        wb += [w, b2]
        w_specs += [pl.BlockSpec(w.shape, lambda i: (0, 0)),
                    pl.BlockSpec(b2.shape, lambda i: (0, 0))]
        w_bytes += (w.size + b2.size) * 4

    x_block = bt * C * HW * itemsize
    vmem_needed = 4 * x_block + bt * C * HW * 4 + 2 * w_bytes + (6 << 20)

    return pl.pallas_call(
        functools.partial(_fused_kernel, inv_hw=1.0 / HW),
        out_shape=jax.ShapeDtypeStruct((B, C, HW), x3.dtype),
        grid_spec=pltpu.PrefetchScalarGridSpec(
            num_scalar_prefetch=0,
            grid=(nb,),
            in_specs=[pl.BlockSpec((bt, C, HW), lambda i: (i, 0, 0))] + w_specs,
            out_specs=pl.BlockSpec((bt, C, HW), lambda i: (i, 0, 0)),
        ),
        compiler_params=pltpu.CompilerParams(
            dimension_semantics=("parallel",),
            vmem_limit_bytes=_clamp_vmem(vmem_needed, vmem_cap),
        ),
        cost_estimate=pl.CostEstimate(
            flops=2 * B * C * HW,
            transcendentals=0,
            bytes_accessed=2 * B * C * HW * itemsize + w_bytes,
        ),
    )(x3, *wb)


# ---------------------------------------------------------------------------
# Wrapper
# ---------------------------------------------------------------------------
def channel_attention(x, params, *, eps=1e-5, path="auto", _force_num_tc=None):
    """x: (B, C, H, W) NCHW.  Returns the broadcast (expand_as) gate, same shape."""
    B, C, H, W = x.shape
    HW = H * W
    itemsize = x.dtype.itemsize
    x3 = x.reshape(B, C, HW)
    layers = _fold_bn(params, eps)

    vmem_phys, num_tc = _device_caps()
    if _force_num_tc is not None:
        num_tc = _force_num_tc
    vmem_cap = (vmem_phys * 3) // 4                       # headroom under physical VMEM
    target = (16 << 20) if vmem_cap >= (80 << 20) else (12 << 20)

    total_bytes = B * C * HW * itemsize
    use_fused = (path == "fused") or (path == "auto" and total_bytes <= (2 << 20))
    if use_fused:
        out3 = _fused_forward(x3, layers, B, C, HW, itemsize, num_tc, vmem_cap)
        return out3.reshape(B, C, H, W)

    # ---------------- pass 1: tiled global average pool ---------------------
    bt, hwt, cw, n_split, nk, nkk = _choose_tiles(B, C, HW, itemsize, num_tc, target)
    nb = B // bt
    needs_mask = (n_split * nk * hwt != HW)

    x_block = bt * C * hwt * itemsize
    acc_block = bt * C * cw * 4
    pool_vmem = 2 * x_block + acc_block + 2 * bt * C * 4 + (6 << 20)

    pooled_parts = pl.pallas_call(
        functools.partial(_pool_kernel, hwt=hwt, cw=cw, hw=HW, nk=nk, needs_mask=needs_mask),
        out_shape=jax.ShapeDtypeStruct((n_split, B, C, 1), jnp.float32),
        grid_spec=pltpu.PrefetchScalarGridSpec(
            num_scalar_prefetch=0,
            grid=(nb, n_split, nk),
            in_specs=[pl.BlockSpec(
                (bt, C, hwt),
                lambda b, s, k: (b, 0, jnp.minimum(s * nk + k, nkk - 1)))],
            out_specs=pl.BlockSpec((1, bt, C, 1), lambda b, s, k: (s, b, 0, 0)),
            scratch_shapes=[pltpu.VMEM((bt, C, cw), jnp.float32)],
        ),
        compiler_params=pltpu.CompilerParams(
            dimension_semantics=("parallel", "parallel", "arbitrary"),
            vmem_limit_bytes=_clamp_vmem(pool_vmem, vmem_cap),
        ),
        cost_estimate=pl.CostEstimate(
            flops=B * C * HW,
            transcendentals=0,
            bytes_accessed=B * C * HW * itemsize + n_split * B * C * 4,
        ),
    )(x3)

    pooled = pooled_parts.sum(axis=0)[:, :, 0] * (1.0 / HW)          # (B, C) f32

    # ------- pass 2: tiny folded-BN MLP, once per batch, in plain XLA -------
    h = pooled
    for li, (w, b) in enumerate(layers):
        h = h @ w + b
        if li < len(layers) - 1:
            h = jnp.maximum(h, 0.0)
    gate = h.astype(x.dtype)[:, :, None]                             # (B, C, 1)

    # --------------- pass 3: tiled lane-dense broadcast write ---------------
    nhw = pl.cdiv(HW, hwt)
    out_block = bt * C * hwt * itemsize
    bcast_vmem = 3 * out_block + 2 * bt * C * itemsize + (6 << 20)

    out3 = pl.pallas_call(
        _broadcast_kernel,
        out_shape=jax.ShapeDtypeStruct((B, C, HW), x.dtype),
        grid_spec=pltpu.PrefetchScalarGridSpec(
            num_scalar_prefetch=0,
            grid=(nb, nhw),
            in_specs=[pl.BlockSpec((bt, C, 1), lambda b, k: (b, 0, 0))],
            out_specs=pl.BlockSpec((bt, C, hwt), lambda b, k: (b, 0, k)),
        ),
        compiler_params=pltpu.CompilerParams(
            dimension_semantics=("parallel", "parallel"),
            vmem_limit_bytes=_clamp_vmem(bcast_vmem, vmem_cap),
        ),
        cost_estimate=pl.CostEstimate(
            flops=0,
            transcendentals=0,
            bytes_accessed=B * C * HW * itemsize + B * C * itemsize,
        ),
    )(gate)

    return out3.reshape(B, C, H, W)


# ---------------------------------------------------------------------------
# Synthetic parameters + pure-JAX reference
# ---------------------------------------------------------------------------
def make_params(key, channel, reduction=16, num_layers=3):
    """Deterministic synthetic parameters matching ChannelAttention.__init__ shapes."""
    gate = [channel] + [channel // reduction] * num_layers + [channel]
    keys = jax.random.split(key, 2 * (len(gate) - 1))
    hidden = []
    ki = 0
    for i in range(len(gate) - 2):
        fan_in, fan_out = gate[i], gate[i + 1]
        w = jax.random.normal(keys[ki], (fan_in, fan_out), jnp.float32) / jnp.sqrt(fan_in)
        ki += 1
        b = 0.01 * jax.random.normal(keys[ki], (fan_out,), jnp.float32)
        ki += 1
        # BatchNorm1d defaults: weight=1, bias=0, running_mean=0, running_var=1
        gamma = jnp.ones((fan_out,), jnp.float32)
        beta = jnp.zeros((fan_out,), jnp.float32)
        rm = jnp.zeros((fan_out,), jnp.float32)
        rv = jnp.ones((fan_out,), jnp.float32)
        hidden.append((w, b, gamma, beta, rm, rv))
    fan_in, fan_out = gate[-2], gate[-1]
    last_w = jax.random.normal(keys[ki], (fan_in, fan_out), jnp.float32) / jnp.sqrt(fan_in)
    ki += 1
    last_b = 0.01 * jax.random.normal(keys[ki], (fan_out,), jnp.float32)
    return {"hidden": hidden, "last_w": last_w, "last_b": last_b}


def ref_forward(x, params, *, eps=1e-5):
    """Pure-JAX reference (eval-mode BN), for correctness checking."""
    pooled = jnp.mean(x, axis=(2, 3))  # (B, C)
    h = pooled
    for (w, b, gamma, beta, rm, rv) in params["hidden"]:
        h = h @ w + b
        h = gamma * (h - rm) / jnp.sqrt(rv + eps) + beta
        h = jnp.maximum(h, 0.0)
    gate = h @ params["last_w"] + params["last_b"]
    return jnp.broadcast_to(gate[:, :, None, None], x.shape)


if __name__ == "__main__":
    key = jax.random.PRNGKey(0)
    kx1, kx2, kx3, kp = jax.random.split(key, 4)

    # 1) Small shape -> fused single-kernel path (pool + MLP + broadcast).
    B, C, H, W = 2, 64, 16, 16            # channel=64, reduction=16 -> hidden width 4
    x = jax.random.normal(kx1, (B, C, H, W), jnp.float32)
    params = make_params(kp, C, reduction=16, num_layers=3)
    ref = ref_forward(x, params)

    out_fused = jax.block_until_ready(channel_attention(x, params))
    assert out_fused.shape == x.shape
    assert jnp.allclose(out_fused, ref, rtol=1e-5, atol=1e-5), "fused path mismatch"

    # 2) Same input forced through the tiled two-pass path.
    out_tiled = jax.block_until_ready(channel_attention(x, params, path="tiled"))
    assert jnp.allclose(out_tiled, ref, rtol=1e-5, atol=1e-5), "tiled path mismatch"

    # 3) Non-128-aligned spatial size -> masked partial HW blocks.
    x2 = jax.random.normal(kx2, (1, 32, 14, 14), jnp.float32)
    params2 = make_params(kp, 32, reduction=16, num_layers=3)
    out2 = jax.block_until_ready(channel_attention(x2, params2, path="tiled"))
    assert jnp.allclose(out2, ref_forward(x2, params2), rtol=1e-5, atol=1e-5), \
        "masked tiled path mismatch"

    # 4) B=1 with a forced 2-TensorCore split of the HW reduction (v7x path),
    #    combined with masking (HW=900 is not 128-aligned).
    x3 = jax.random.normal(kx3, (1, 64, 30, 30), jnp.float32)
    out3 = jax.block_until_ready(
        channel_attention(x3, params, path="tiled", _force_num_tc=2))
    assert jnp.allclose(out3, ref_forward(x3, params), rtol=1e-5, atol=1e-5), \
        "split-reduction tiled path mismatch"

    print("KERNEL_OK")
</pallas_src>

<mosaic_0001>
module attributes {stable_mosaic.version = 11 : i64} {
  func.func @_fused_kernel(%arg0: i32, %arg1: memref<2x64x256xf32, #tpu.memory_space<vmem>>, %arg2: memref<64x4xf32, #tpu.memory_space<vmem>>, %arg3: memref<1x4xf32, #tpu.memory_space<vmem>>, %arg4: memref<4x4xf32, #tpu.memory_space<vmem>>, %arg5: memref<1x4xf32, #tpu.memory_space<vmem>>, %arg6: memref<4x4xf32, #tpu.memory_space<vmem>>, %arg7: memref<1x4xf32, #tpu.memory_space<vmem>>, %arg8: memref<4x64xf32, #tpu.memory_space<vmem>>, %arg9: memref<1x64xf32, #tpu.memory_space<vmem>>, %arg10: memref<2x64x256xf32, #tpu.memory_space<vmem>>) attributes {dimension_semantics = [#tpu.dimension_semantics<parallel>], iteration_bounds = array<i64: 1>, scalar_prefetch = 0 : i64, scratch_operands = 0 : i64, tpu.core_type = #tpu.core_type<tc>, window_params = [{transform_indices = @transform_0, window_bounds = array<i64: 2, 64, 256>}, {pipeline_mode = #tpu.pipeline_mode<synchronous>, transform_indices = @transform_1, window_bounds = array<i64: 64, 4>}, {pipeline_mode = #tpu.pipeline_mode<synchronous>, transform_indices = @transform_2, window_bounds = array<i64: 1, 4>}, {pipeline_mode = #tpu.pipeline_mode<synchronous>, transform_indices = @transform_3, window_bounds = array<i64: 4, 4>}, {pipeline_mode = #tpu.pipeline_mode<synchronous>, transform_indices = @transform_4, window_bounds = array<i64: 1, 4>}, {pipeline_mode = #tpu.pipeline_mode<synchronous>, transform_indices = @transform_5, window_bounds = array<i64: 4, 4>}, {pipeline_mode = #tpu.pipeline_mode<synchronous>, transform_indices = @transform_6, window_bounds = array<i64: 1, 4>}, {pipeline_mode = #tpu.pipeline_mode<synchronous>, transform_indices = @transform_7, window_bounds = array<i64: 4, 64>}, {pipeline_mode = #tpu.pipeline_mode<synchronous>, transform_indices = @transform_8, window_bounds = array<i64: 1, 64>}, {transform_indices = @transform_9, window_bounds = array<i64: 2, 64, 256>}]} {
    %c0 = arith.constant 0 : index
    %c0_0 = arith.constant 0 : index
    %c0_1 = arith.constant 0 : index
    %0 = vector.load %arg1[%c0, %c0_0, %c0_1] : memref<2x64x256xf32, #tpu.memory_space<vmem>>, vector<2x64x256xf32>
    %cst = arith.constant dense<0.000000e+00> : vector<2x64xf32>
    %1 = vector.multi_reduction <add>, %0, %cst [2] : vector<2x64x256xf32> to vector<2x64xf32>
    %cst_2 = arith.constant 3.906250e-03 : f32
    %2 = vector.broadcast %cst_2 : f32 to vector<2x64xf32>
    %3 = arith.mulf %1, %2 : vector<2x64xf32>
    %c0_3 = arith.constant 0 : index
    %c0_4 = arith.constant 0 : index
    %4 = vector.load %arg2[%c0_3, %c0_4] : memref<64x4xf32, #tpu.memory_space<vmem>>, vector<64x4xf32>
    %c0_5 = arith.constant 0 : index
    %c0_6 = arith.constant 0 : index
    %5 = vector.load %arg3[%c0_5, %c0_6] : memref<1x4xf32, #tpu.memory_space<vmem>>, vector<1x4xf32>
    %cst_7 = arith.constant dense<0.000000e+00> : vector<2x4xf32>
    %6 = tpu.matmul %3, %4, %cst_7 {dimension_numbers = #tpu.dot_dimension_numbers<[1], [0], [0], [1], [0, 0, 1, 1], [], []>} : vector<2x64xf32>, vector<64x4xf32>, vector<2x4xf32> -> vector<2x4xf32>
    %7 = vector.broadcast %5 : vector<1x4xf32> to vector<2x4xf32>
    %8 = arith.addf %6, %7 : vector<2x4xf32>
    %cst_8 = arith.constant 0.000000e+00 : f32
    %9 = vector.broadcast %cst_8 : f32 to vector<2x4xf32>
    %10 = arith.maximumf %8, %9 : vector<2x4xf32>
    %c0_9 = arith.constant 0 : index
    %c0_10 = arith.constant 0 : index
    %11 = vector.load %arg4[%c0_9, %c0_10] : memref<4x4xf32, #tpu.memory_space<vmem>>, vector<4x4xf32>
    %c0_11 = arith.constant 0 : index
    %c0_12 = arith.constant 0 : index
    %12 = vector.load %arg5[%c0_11, %c0_12] : memref<1x4xf32, #tpu.memory_space<vmem>>, vector<1x4xf32>
    %cst_13 = arith.constant dense<0.000000e+00> : vector<2x4xf32>
    %13 = tpu.matmul %10, %11, %cst_13 {dimension_numbers = #tpu.dot_dimension_numbers<[1], [0], [0], [1], [0, 0, 1, 1], [], []>} : vector<2x4xf32>, vector<4x4xf32>, vector<2x4xf32> -> vector<2x4xf32>
    %14 = vector.broadcast %12 : vector<1x4xf32> to vector<2x4xf32>
    %15 = arith.addf %13, %14 : vector<2x4xf32>
    %cst_14 = arith.constant 0.000000e+00 : f32
    %16 = vector.broadcast %cst_14 : f32 to vector<2x4xf32>
    %17 = arith.maximumf %15, %16 : vector<2x4xf32>
    %c0_15 = arith.constant 0 : index
    %c0_16 = arith.constant 0 : index
    %18 = vector.load %arg6[%c0_15, %c0_16] : memref<4x4xf32, #tpu.memory_space<vmem>>, vector<4x4xf32>
    %c0_17 = arith.constant 0 : index
    %c0_18 = arith.constant 0 : index
    %19 = vector.load %arg7[%c0_17, %c0_18] : memref<1x4xf32, #tpu.memory_space<vmem>>, vector<1x4xf32>
    %cst_19 = arith.constant dense<0.000000e+00> : vector<2x4xf32>
    %20 = tpu.matmul %17, %18, %cst_19 {dimension_numbers = #tpu.dot_dimension_numbers<[1], [0], [0], [1], [0, 0, 1, 1], [], []>} : vector<2x4xf32>, vector<4x4xf32>, vector<2x4xf32> -> vector<2x4xf32>
    %21 = vector.broadcast %19 : vector<1x4xf32> to vector<2x4xf32>
    %22 = arith.addf %20, %21 : vector<2x4xf32>
    %cst_20 = arith.constant 0.000000e+00 : f32
    %23 = vector.broadcast %cst_20 : f32 to vector<2x4xf32>
    %24 = arith.maximumf %22, %23 : vector<2x4xf32>
    %c0_21 = arith.constant 0 : index
    %c0_22 = arith.constant 0 : index
    %25 = vector.load %arg8[%c0_21, %c0_22] : memref<4x64xf32, #tpu.memory_space<vmem>>, vector<4x64xf32>
    %c0_23 = arith.constant 0 : index
    %c0_24 = arith.constant 0 : index
    %26 = vector.load %arg9[%c0_23, %c0_24] : memref<1x64xf32, #tpu.memory_space<vmem>>, vector<1x64xf32>
    %cst_25 = arith.constant dense<0.000000e+00> : vector<2x64xf32>
    %27 = tpu.matmul %24, %25, %cst_25 {dimension_numbers = #tpu.dot_dimension_numbers<[1], [0], [0], [1], [0, 0, 1, 1], [], []>} : vector<2x4xf32>, vector<4x64xf32>, vector<2x64xf32> -> vector<2x64xf32>
    %28 = vector.broadcast %26 : vector<1x64xf32> to vector<2x64xf32>
    %29 = arith.addf %27, %28 : vector<2x64xf32>
    %30 = vector.shape_cast %29 : vector<2x64xf32> to vector<2x64x1xf32>
    %31 = vector.shape_cast %30 : vector<2x64x1xf32> to vector<2x64x1xf32>
    %32 = vector.broadcast %31 : vector<2x64x1xf32> to vector<2x64x256xf32>
    %c0_26 = arith.constant 0 : index
    %c0_27 = arith.constant 0 : index
    %c0_28 = arith.constant 0 : index
    %33 = vector.load %arg10[%c0_26, %c0_27, %c0_28] : memref<2x64x256xf32, #tpu.memory_space<vmem>>, vector<2x64x256xf32>
    tpu.vector_store %arg10[%c0_26, %c0_27, %c0_28], %32 {strides = array<i32>} : memref<2x64x256xf32, #tpu.memory_space<vmem>>, vector<2x64x256xf32>,
    return
  }
  func.func @transform_0(%arg0: i32) -> (i32, i32, i32) {
    %c0_i32 = arith.constant 0 : i32
    %c0_i32_0 = arith.constant 0 : i32
    %c0_i32_1 = arith.constant 0 : i32
    return %arg0, %c0_i32, %c0_i32_0 : i32, i32, i32
  }
  func.func @transform_1(%arg0: i32) -> (i32, i32) {
    %c0_i32 = arith.constant 0 : i32
    %c0_i32_0 = arith.constant 0 : i32
    %c0_i32_1 = arith.constant 0 : i32
    return %c0_i32, %c0_i32_0 : i32, i32
  }
  func.func @transform_2(%arg0: i32) -> (i32, i32) {
    %c0_i32 = arith.constant 0 : i32
    %c0_i32_0 = arith.constant 0 : i32
    %c0_i32_1 = arith.constant 0 : i32
    return %c0_i32, %c0_i32_0 : i32, i32
  }
  func.func @transform_3(%arg0: i32) -> (i32, i32) {
    %c0_i32 = arith.constant 0 : i32
    %c0_i32_0 = arith.constant 0 : i32
    %c0_i32_1 = arith.constant 0 : i32
    return %c0_i32, %c0_i32_0 : i32, i32
  }
  func.func @transform_4(%arg0: i32) -> (i32, i32) {
    %c0_i32 = arith.constant 0 : i32
    %c0_i32_0 = arith.constant 0 : i32
    %c0_i32_1 = arith.constant 0 : i32
    return %c0_i32, %c0_i32_0 : i32, i32
  }
  func.func @transform_5(%arg0: i32) -> (i32, i32) {
    %c0_i32 = arith.constant 0 : i32
    %c0_i32_0 = arith.constant 0 : i32
    %c0_i32_1 = arith.constant 0 : i32
    return %c0_i32, %c0_i32_0 : i32, i32
  }
  func.func @transform_6(%arg0: i32) -> (i32, i32) {
    %c0_i32 = arith.constant 0 : i32
    %c0_i32_0 = arith.constant 0 : i32
    %c0_i32_1 = arith.constant 0 : i32
    return %c0_i32, %c0_i32_0 : i32, i32
  }
  func.func @transform_7(%arg0: i32) -> (i32, i32) {
    %c0_i32 = arith.constant 0 : i32
    %c0_i32_0 = arith.constant 0 : i32
    %c0_i32_1 = arith.constant 0 : i32
    return %c0_i32, %c0_i32_0 : i32, i32
  }
  func.func @transform_8(%arg0: i32) -> (i32, i32) {
    %c0_i32 = arith.constant 0 : i32
    %c0_i32_0 = arith.constant 0 : i32
    %c0_i32_1 = arith.constant 0 : i32
    return %c0_i32, %c0_i32_0 : i32, i32
  }
  func.func @transform_9(%arg0: i32) -> (i32, i32, i32) {
    %c0_i32 = arith.constant 0 : i32
    %c0_i32_0 = arith.constant 0 : i32
    %c0_i32_1 = arith.constant 0 : i32
    return %arg0, %c0_i32, %c0_i32_0 : i32, i32, i32
  }
}

</mosaic_0001>

<bundles_post_ra>
// kernel: tpu_custom_call.1
= control target key start
LH: loop header
LB: loop body
LE: loop exit
PB: predicated region body
PF: predicated region fallthrough
CT: control target
= control target key end

     0   :  { %14 = vsyncpa [#allocation3], 0  ;;  %s1019_s0 = inlined_call_operand.hbm [shape: f32[2,64,256], index: 0, kind: input, shape index: {}]   ;;  %s1020_s1 = inlined_call_operand.vmem [shape: f32[64,4], index: 1, kind: input, shape index: {}]   ;;  %s1021_s2 = inlined_call_operand.vmem [shape: f32[1,4], index: 2, kind: input, shape index: {}]   ;;  %s1022_s3 = inlined_call_operand.vmem [shape: f32[4,4], index: 3, kind: input, shape index: {}]   ;;  %s1023_s4 = inlined_call_operand.vmem [shape: f32[1,4], index: 4, kind: input, shape index: {}]   ;;  %s1024_s5 = inlined_call_operand.vmem [shape: f32[4,4], index: 5, kind: input, shape index: {}]   ;;  %s1025_s6 = inlined_call_operand.vmem [shape: f32[1,4], index: 6, kind: input, shape index: {}]   ;;  %s1026_s7 = inlined_call_operand.vmem [shape: f32[4,64], index: 7, kind: input, shape index: {}]   ;;  %s1027_s8 = inlined_call_operand.vmem [shape: f32[1,64], index: 8, kind: input, shape index: {}]   ;;  %s1028_s9 = inlined_call_operand.hbm [shape: f32[2,64,256], index: 9, kind: output, shape index: {}]  }
   0x1   :  { %15 = vsyncpa [#allocation4], 0  ;;  %s846_s30 = smov [#allocation2]   ;;  %s798_s13 = scalar_lea.hbm %s1019_s0, 4096 }
   0x2   :  { %s21_s10 = sshll.u32 %s846_s30, 4  ;;  %p799_p0 = scmp.ne.s32.totalorder %s1019_s0, %s798_s13  ;;  %s22_s10 = int_to_ptr.vmem [resolvable:$true] %s21_s10 }
   0x3   :  { %p802_p1 = scmp.lt.u32.totalorder %s798_s13, %s1019_s0 }
   0x5   :  { %p804_p2 = pnand %p802_p1, %p799_p0 }
   0x7   :  { %807 = shalt.err (!%p804_p2)
}
   0x8   :  { %s808_s18 = scalar_lea.vmem %s22_s10, 4096  ;;  %p813_p4 = scmp.lt.s32.totalorder %s22_s10, %s22_s10 }
   0x9   :  { %p809_p3 = scmp.ne.s32.totalorder %s22_s10, %s808_s18  ;;  %p814_p5 = scmp.lt.s32.totalorder %s808_s18, %s808_s18 }
   0xb   :  { %p815_p6 = por %p814_p5, %p813_p4 }
   0xd   :  { %p816_p7 = pnand %p815_p6, %p809_p3 }
   0xf   :  { %819 = shalt.err (!%p816_p7)
}
  0x10   :  { %s847_s19 = smov 256   ;;  %s848_s20 = smov 16  }
  0x11   :  { %27 = dma.hbm_to_vmem [thread:$0]  %s1019_s0, 4096, %s22_s10, [#allocation3], %s847_s19, %s847_s19, %s848_s20  }
  0x12   :  { %842 = dma.done.wait [#allocation3], 4096  }
  0x13   :  { %843 = vsyncadd [#allocation3], 4294963200  ;;  %v63_v0 = vld [vmem:[#allocation2 + $0x80] sm:$0xff]  ;;  %v64_v1 = vld [vmem:[#allocation2 + $0x88] sm:$0xff]  ;;  %v849_v51 = vmov 0.0|0.0   ;;  %vm850_vm0 = vmmov 0  }
  0x14   :  { %v47_v2 = vld [vmem:[#allocation2] sm:$0xff]  ;;  %v103_v3 = vadd.f32 %v64_v1, %v63_v0  ;;  %v48_v4 = vld [vmem:[#allocation2 + $0x8] sm:$0xff]  ;;  %v65_v5 = vld [vmem:[#allocation2 + $0x90] sm:$0xff]  ;;  %779 = vmatprep.subr.bf16.mxu0 %v849_v51  ;;  %v851_v61 = vmov 0.0   ;;  %vm185_vm1 = vcmask 130112   ;;  %vm192_vm2 = vcmask 195712  }
  0x15   :  { %v66_v6 = vld [vmem:[#allocation2 + $0x98] sm:$0xff]  ;;  %v79_v7 = vadd.f32 %v48_v4, %v47_v2  ;;  %v49_v8 = vld [vmem:[#allocation2 + $0x10] sm:$0xff]  ;;  %v67_v12 = vld [vmem:[#allocation2 + $0xa0] sm:$0xff]  ;;  %761 = vmatprep.mubr.msk.f32.mxu0 %vm850_vm0, %v851_v61  ;;  %764 = vmatprep.subr.mxu1 %v851_v61  ;;  %v174_v2 = vlaneseq  ;;  %vm199_vm3 = vcmask 261312   ;;  %vm206_vm4 = vcmask 326912  }
  0x16   :  { %v50_v9 = vld [vmem:[#allocation2 + $0x18] sm:$0xff]  ;;  %104 = vadd.xlane.f32.xlu1 %v103_v3  ;;  %v106_v10 = vadd.f32 %v66_v6, %v65_v5  ;;  %v68_v13 = vld [vmem:[#allocation2 + $0xa8] sm:$0xff]  ;;  %v51_v14 = vld [vmem:[#allocation2 + $0x20] sm:$0xff]  ;;  %766 = vmatprep.mubr.msk.f32.mxu1 %vm850_vm0, %v851_v61  ;;  %vm213_vm5 = vcmask 392512   ;;  %vm220_vm6 = vcmask 458112   ;;  %vm227_vm7 = vcmask 523712  }
  0x17   :  { %80 = vadd.xlane.f32.xlu0 %v79_v7  ;;  %v82_v11 = vadd.f32 %v50_v9, %v49_v8  ;;  %v52_v15 = vld [vmem:[#allocation2 + $0x28] sm:$0xff]  ;;  %v109_v16 = vadd.f32 %v68_v13, %v67_v12  ;;  %v69_v18 = vld [vmem:[#allocation2 + $0xb0] sm:$0xff]  ;;  %v70_v19 = vld [vmem:[#allocation2 + $0xb8] sm:$0xff]  ;;  %v175_v5 = vand.u32 127, %v174_v2  ;;  %v947_v7 = vshrl.u32 %v174_v2, 7 }
  0x18   :  { %v85_v17 = vadd.f32 %v52_v15, %v51_v14  ;;  %v53_v20 = vld [vmem:[#allocation2 + $0x30] sm:$0xff]  ;;  %v54_v21 = vld [vmem:[#allocation2 + $0x38] sm:$0xff]  ;;  %v112_v22 = vadd.f32 %v70_v19, %v69_v18  ;;  %v71_v24 = vld [vmem:[#allocation2 + $0xc0] sm:$0xff]  ;;  %vm268_vm8 = vcmask 1041409   ;;  %vm270_vm9 = vcmask 523264  }
  0x19   :  { %v88_v23 = vadd.f32 %v54_v21, %v53_v20  ;;  %v72_v25 = vld [vmem:[#allocation2 + $0xc8] sm:$0xff]  ;;  %v55_v26 = vld [vmem:[#allocation2 + $0x40] sm:$0xff]  ;;  %v73_v30 = vld [vmem:[#allocation2 + $0xd0] sm:$0xff]  ;;  %v180_v9 = vadd.s32 4294967288, %v175_v5  ;;  %v201_v12 = vadd.s32 4294967264, %v175_v5  ;;  %v208_v14 = vadd.s32 4294967256, %v175_v5 }
  0x1a   :  { %107 = vadd.xlane.f32.xlu1 %v106_v10  ;;  %v56_v27 = vld [vmem:[#allocation2 + $0x48] sm:$0xff]  ;;  %v115_v28 = vadd.f32 %v72_v25, %v71_v24  ;;  %v74_v31 = vld [vmem:[#allocation2 + $0xd8] sm:$0xff]  ;;  %v57_v32 = vld [vmem:[#allocation2 + $0x50] sm:$0xff]  ;;  %v187_v10 = vadd.s32 4294967280, %v175_v5  ;;  %v178_v15 = vsub.s32 %v175_v5, %v947_v7  ;;  %v215_v19 = vadd.s32 4294967248, %v175_v5 }
  0x1b   :  { %83 = vadd.xlane.f32.xlu0 %v82_v11  ;;  %v91_v29 = vadd.f32 %v56_v27, %v55_v26  ;;  %v58_v33 = vld [vmem:[#allocation2 + $0x58] sm:$0xff]  ;;  %v118_v34 = vadd.f32 %v74_v31, %v73_v30  ;;  %v75_v36 = vld [vmem:[#allocation2 + $0xe0] sm:$0xff]  ;;  %v76_v37 = vld [vmem:[#allocation2 + $0xe8] sm:$0xff]  ;;  %v194_v11 = vadd.s32 4294967272, %v175_v5  ;;  %v211_v25 = vsub.s32 %v208_v14, %v947_v7 }
  0x1c   :  { %v94_v35 = vadd.f32 %v58_v33, %v57_v32  ;;  %v59_v38 = vld [vmem:[#allocation2 + $0x60] sm:$0xff]  ;;  %v60_v39 = vld [vmem:[#allocation2 + $0x68] sm:$0xff]  ;;  %v121_v40 = vadd.f32 %v76_v37, %v75_v36  ;;  %v77_v42 = vld [vmem:[#allocation2 + $0xf0] sm:$0xff]  ;;  %v190_v18 = vsub.s32 %v187_v10, %v947_v7  ;;  %vm356_vm10 = vcmask 1043456  }
  0x1d   :  { %v97_v41 = vadd.f32 %v60_v39, %v59_v38  ;;  %v78_v43 = vld [vmem:[#allocation2 + $0xf8] sm:$0xff]  ;;  %v61_v44 = vld [vmem:[#allocation2 + $0x70] sm:$0xff]  ;;  %v143_v48 = vld [vmem:[%s1020_s1] sm:$0xff]  ;;  %v197_v21 = vsub.s32 %v194_v11, %v947_v7  ;;  %v222_v38 = vadd.s32 4294967240, %v175_v5  ;;  %vm352_vm11 = vcmask 31744  }
  0x1e   :  { %110 = vadd.xlane.f32.xlu1 %v109_v16  ;;  %v62_v45 = vld [vmem:[#allocation2 + $0x78] sm:$0xff]  ;;  %v124_v46 = vadd.f32 %v78_v43, %v77_v42  ;;  %v144_v49 = vld [vmem:[%s1020_s1 + $0x8] sm:$0xff]  ;;  %v145_v52 = vld [vmem:[%s1020_s1 + $0x10] sm:$0xff] }
  0x1f   :  { %86 = vadd.xlane.f32.xlu0 %v85_v17  ;;  %v100_v47 = vadd.f32 %v62_v45, %v61_v44  ;;  %v780_v50 = vpack.c.bf16 %v144_v49, %v143_v48  ;;  %v146_v53 = vld [vmem:[%s1020_s1 + $0x18] sm:$0xff]  ;;  %v147_v55 = vld [vmem:[%s1020_s1 + $0x20] sm:$0xff]  ;;  %v148_v56 = vld [vmem:[%s1020_s1 + $0x28] sm:$0xff]  ;;  %v183_v17 = vsub.s32 %v180_v9, %v947_v7 }
  0x20   :  { %v783_v54 = vpack.c.bf16 %v146_v53, %v145_v52  ;;  %v786_v57 = vpack.c.bf16 %v148_v56, %v147_v55  ;;  %v149_v58 = vld [vmem:[%s1020_s1 + $0x30] sm:$0xff]  ;;  %v150_v59 = vld [vmem:[%s1020_s1 + $0x38] sm:$0xff]  ;;  %v225_v55 = vsub.s32 %v222_v38, %v947_v7 }
  0x21   :  { %781 = vmatpush3.bf16.msra.mxu0 %v780_v50  ;;  %v789_v60 = vpack.c.bf16 %v150_v59, %v149_v58 }
  0x22   :  { %113 = vadd.xlane.f32.xlu1 %v112_v22  ;;  %782 = vmatprep.subr.bf16.mxu0 %v849_v51  ;;  %v204_v22 = vsub.s32 %v201_v12, %v947_v7 }
  0x23   :  { %89 = vadd.xlane.f32.xlu0 %v88_v23 }
  0x25   :  { %784 = vmatpush3.bf16.msra.mxu0 %v783_v54 }
  0x26   :  { %116 = vadd.xlane.f32.xlu1 %v115_v28  ;;  %785 = vmatprep.subr.bf16.mxu0 %v849_v51 }
  0x27   :  { %92 = vadd.xlane.f32.xlu0 %v91_v29 }
  0x29   :  { %787 = vmatpush3.bf16.msra.mxu0 %v786_v57 }
  0x2a   :  { %119 = vadd.xlane.f32.xlu1 %v118_v34  ;;  %788 = vmatprep.subr.bf16.mxu0 %v849_v51  ;;  %v218_v34 = vsub.s32 %v215_v19, %v947_v7 }
  0x2b   :  { %95 = vadd.xlane.f32.xlu0 %v94_v35 }
  0x2d   :  { %790 = vmatpush3.bf16.msra.mxu0 %v789_v60 }
  0x2e   :  { %122 = vadd.xlane.f32.xlu1 %v121_v40 }
  0x2f   :  { %98 = vadd.xlane.f32.xlu0 %v97_v41 }
  0x32   :  { %125 = vadd.xlane.f32.xlu1 %v124_v46 }
  0x33   :  { %101 = vadd.xlane.f32.xlu0 %v100_v47 }
  0xa3   :  { %v105_v62 = vpop.xlane.xlu1 %104 }
  0xa4   :  { %v81_v63 = vpop.xlane.xlu0 %80  ;;  %v135_v27 = vmul.f32 0.00390625, %v105_v62 }
  0xa5   :  { %v127_v31 = vmul.f32 0.00390625, %v81_v63 }
  0xa6   :  { %v232_v43 = vrot.slane %v135_v27, %v178_v15 }
  0xa7   :  { %v108_v0 = vpop.xlane.xlu1 %107  ;;  %v179_v48 = vrot.slane %v127_v31, %v178_v15 }
  0xa8   :  { %v84_v1 = vpop.xlane.xlu0 %83  ;;  %v136_v20 = vmul.f32 0.00390625, %v108_v0 }
  0xa9   :  { %v128_v23 = vmul.f32 0.00390625, %v84_v1 }
  0xaa   :  { %v236_v35 = vrot.slane %v136_v20, %v183_v17 }
  0xab   :  { %v111_v3 = vpop.xlane.xlu1 %110  ;;  %v184_v39 = vrot.slane %v128_v23, %v183_v17  ;;  %v344_v17 = vld [vmem:[%s1022_s3] sm:$0xf] }
  0xac   :  { %v87_v4 = vpop.xlane.xlu0 %86  ;;  %v137_v24 = vmul.f32 0.00390625, %v111_v3  ;;  %v237_v52 = vsel %vm185_vm1, %v236_v35, %v232_v43  ;;  %765 = vmatpush3.msk.msra.mxu1 %vm356_vm10, %v344_v17  ;;  %v431_v23 = vld [vmem:[%s1024_s5] sm:$0xf]  ;;  %v602_v35 = vsub.s32 0, %v947_v7 }
  0xad   :  { %v129_v28 = vmul.f32 0.00390625, %v87_v4  ;;  %v186_v56 = vsel %vm185_vm1, %v184_v39, %v179_v48  ;;  %769 = vmatprep.subr.mxu1 %v851_v61 }
  0xae   :  { %v241_v40 = vrot.slane %v137_v24, %v190_v18  ;;  %v721_v24 = vld [vmem:[%s1023_s4] ss:$0 sm:$0xff] }
  0xaf   :  { %v114_v6 = vpop.xlane.xlu1 %113  ;;  %v191_v44 = vrot.slane %v129_v28, %v190_v18  ;;  %v719_v18 = vld [vmem:[%s1021_s2] ss:$0 sm:$0xff] }
  0xb0   :  { %v90_v8 = vpop.xlane.xlu0 %89  ;;  %v138_v29 = vmul.f32 0.00390625, %v114_v6  ;;  %v242_v57 = vsel %vm192_vm2, %v241_v40, %v237_v52  ;;  %v637_v40 = vsub.s32 1, %v947_v7 }
  0xb1   :  { %v130_v32 = vmul.f32 0.00390625, %v90_v8  ;;  %v193_v62 = vsel %vm192_vm2, %v191_v44, %v186_v56 }
  0xb2   :  { %v246_v45 = vrot.slane %v138_v29, %v197_v21  ;;  %v516_v29 = vld [vmem:[%s1026_s7] sm:$0xf] }
  0xb3   :  { %v117_v13 = vpop.xlane.xlu1 %116  ;;  %v198_v49 = vrot.slane %v130_v32, %v197_v21 }
  0xb4   :  { %v93_v16 = vpop.xlane.xlu0 %92  ;;  %v139_v33 = vmul.f32 0.00390625, %v117_v13  ;;  %v247_v63 = vsel %vm199_vm3, %v246_v45, %v242_v57 }
  0xb5   :  { %v131_v36 = vmul.f32 0.00390625, %v93_v16  ;;  %v200_v3 = vsel %vm199_vm3, %v198_v49, %v193_v62 }
  0xb6   :  { %v251_v50 = vrot.slane %v139_v33, %v204_v22 }
  0xb7   :  { %v120_v26 = vpop.xlane.xlu1 %119  ;;  %v205_v53 = vrot.slane %v131_v36, %v204_v22 }
  0xb8   :  { %v96_v30 = vpop.xlane.xlu0 %95  ;;  %v140_v37 = vmul.f32 0.00390625, %v120_v26  ;;  %v252_v4 = vsel %vm206_vm4, %v251_v50, %v247_v63 }
  0xb9   :  { %v132_v41 = vmul.f32 0.00390625, %v96_v30  ;;  %v207_v6 = vsel %vm206_vm4, %v205_v53, %v200_v3  ;;  %v724_v30 = vld [vmem:[%s1025_s6] ss:$0 sm:$0xff]  ;;  %s852_s6 = smov [#allocation5]  }
  0xba   :  { %v256_v54 = vrot.slane %v140_v37, %v211_v25  ;;  %s707_s7 = sshll.u32 %s852_s6, 4  ;;  %s708_s7 = int_to_ptr.vmem [resolvable:$true] %s707_s7 }
  0xbb   :  { %v123_v42 = vpop.xlane.xlu1 %122  ;;  %v212_v58 = vrot.slane %v132_v41, %v211_v25  ;;  %p825_p9 = scmp.lt.s32.totalorder %s708_s7, %s708_s7 }
  0xbc   :  { %v141_v46 = vmul.f32 0.00390625, %v123_v42  ;;  %v99_v47 = vpop.xlane.xlu0 %98  ;;  %v257_v8 = vsel %vm213_vm5, %v256_v54, %v252_v4 }
  0xbd   :  { %v133_v51 = vmul.f32 0.00390625, %v99_v47  ;;  %v214_v10 = vsel %vm213_vm5, %v212_v58, %v207_v6 }
  0xbe   :  { %v261_v59 = vrot.slane %v141_v46, %v218_v34 }
  0xbf   :  { %v126_v60 = vpop.xlane.xlu1 %125  ;;  %v219_v0 = vrot.slane %v133_v51, %v218_v34 }
  0xc0   :  { %v142_v1 = vmul.f32 0.00390625, %v126_v60  ;;  %v102_v2 = vpop.xlane.xlu0 %101  ;;  %v262_v11 = vsel %vm220_vm6, %v261_v59, %v257_v8 }
  0xc1   :  { %v134_v5 = vmul.f32 0.00390625, %v102_v2  ;;  %v221_v13 = vsel %vm220_vm6, %v219_v0, %v214_v10 }
  0xc2   :  { %v266_v9 = vrot.slane %v142_v1, %v225_v55 }
  0xc3   :  { %v226_v12 = vrot.slane %v134_v5, %v225_v55 }
  0xc4   :  { %v267_v14 = vsel %vm227_vm7, %v266_v9, %v262_v11 }
  0xc5   :  { %v228_v15 = vsel %vm227_vm7, %v226_v12, %v221_v13 }
  0xc6   :  { %v269_v16 = vsel %vm268_vm8, %v267_v14, %v228_v15 }
  0xc7   :  { %762 = vmatmul.mubr.msk.f32.vlgmr.msra.gmra.mrb[0].mxu0 %vm270_vm9, %v269_v16 }
 0x19a   :  { %v339_v19 = vpop.f32.mrb[0].mxu0 }
 0x19b   :  { %v340_v20 = vadd.f32 %v719_v18, %v339_v19  ;;  %v763_v21 = vpop.f32.mrb[1].mxu0 }
 0x19d   :  { %v343_v22 = vmax.f32 %v340_v20, 0.0 }
 0x19f   :  { %767 = vmatmul.mubr.msk.f32.vlgmr.msra.gmra.mrb[0].mxu1 %vm352_vm11, %v343_v22 }
 0x1a0   :  { %771 = vmatprep.mubr.msk.f32.mxu1 %vm850_vm0, %v851_v61  ;;  %770 = vmatpush3.msk.msra.mxu1 %vm356_vm10, %v431_v23 }
 0x1a1   :  { %774 = vmatprep.subr.mxu1 %v851_v61 }
 0x272   :  { %v426_v25 = vpop.f32.mrb[0].mxu1 }
 0x273   :  { %v427_v26 = vadd.f32 %v721_v24, %v426_v25  ;;  %v768_v27 = vpop.f32.mrb[1].mxu1 }
 0x275   :  { %v430_v28 = vmax.f32 %v427_v26, 0.0 }
 0x277   :  { %772 = vmatmul.mubr.msk.f32.vlgmr.msra.gmra.mrb[2].mxu1 %vm352_vm11, %v430_v28 }
 0x278   :  { %776 = vmatprep.mubr.msk.f32.mxu1 %vm850_vm0, %v851_v61  ;;  %775 = vmatpush3.msk.msra.mxu1 %vm356_vm10, %v516_v29  ;;  %v727_v61 = vld [vmem:[%s1027_s8] ss:$0 sm:$0xff]  ;;  %s820_s8 = scalar_lea.vmem %s708_s7, 4096 }
 0x279   :  { %p821_p8 = scmp.ne.s32.totalorder %s708_s7, %s820_s8  ;;  %p826_p10 = scmp.lt.s32.totalorder %s820_s8, %s820_s8 }
 0x27b   :  { %p827_p11 = por %p826_p10, %p825_p9 }
 0x27d   :  { %p828_p12 = pnand %p827_p11, %p821_p8 }
 0x34a   :  { %v511_v31 = vpop.f32.mrb[2].mxu1 }
 0x34b   :  { %v512_v32 = vadd.f32 %v724_v30, %v511_v31  ;;  %v773_v33 = vpop.f32.mrb[3].mxu1 }
 0x34d   :  { %v515_v34 = vmax.f32 %v512_v32, 0.0 }
 0x34f   :  { %777 = vmatmul.mubr.msk.f32.vlgmr.msra.gmra.mrb[4].mxu1 %vm352_vm11, %v515_v34 }
 0x422   :  { %v596_v36 = vpop.f32.mrb[4].mxu1 }
 0x423   :  { %v597_v37 = vadd.f32 %v727_v61, %v596_v36  ;;  %v778_v38 = vpop.f32.mrb[5].mxu1 }
 0x425   :  { %v603_v39 = vrot.slane %v597_v37, %v602_v35  ;;  %v638_v41 = vrot.slane %v597_v37, %v637_v40 }
 0x427   :  { %609 = vbcast.lane.b32.xlu1 %v603_v39, 264  ;;  %605 = vbcast.lane.b32.xlu0 %v603_v39, 256 }
 0x42b   :  { %613 = vbcast.lane.b32.xlu1 %v603_v39, 272  ;;  %621 = vbcast.lane.b32.xlu0 %v603_v39, 288 }
 0x42f   :  { %617 = vbcast.lane.b32.xlu1 %v603_v39, 280  ;;  %629 = vbcast.lane.b32.xlu0 %v603_v39, 304 }
 0x433   :  { %625 = vbcast.lane.b32.xlu1 %v603_v39, 296  ;;  %640 = vbcast.lane.b32.xlu0 %v638_v41, 256 }
 0x437   :  { %633 = vbcast.lane.b32.xlu1 %v603_v39, 312  ;;  %648 = vbcast.lane.b32.xlu0 %v638_v41, 272 }
 0x43b   :  { %644 = vbcast.lane.b32.xlu1 %v638_v41, 264  ;;  %656 = vbcast.lane.b32.xlu0 %v638_v41, 288 }
 0x43f   :  { %652 = vbcast.lane.b32.xlu1 %v638_v41, 280  ;;  %664 = vbcast.lane.b32.xlu0 %v638_v41, 304 }
 0x443   :  { %660 = vbcast.lane.b32.xlu1 %v638_v41, 296 }
 0x447   :  { %668 = vbcast.lane.b32.xlu1 %v638_v41, 312 }
 0x499   :  { %v610_v42 = vpop.permute.xlu1 %609  ;;  %v606_v43 = vpop.permute.xlu0 %605 }
 0x49a   :  { %672 = vst [vmem:[#allocation5 + $0x10] sm:$0xff] %v610_v42  ;;  %673 = vst [vmem:[#allocation5 + $0x18] sm:$0xff] %v610_v42 }
 0x49b   :  { %670 = vst [vmem:[#allocation5] sm:$0xff] %v606_v43  ;;  %671 = vst [vmem:[#allocation5 + $0x8] sm:$0xff] %v606_v43 }
 0x49d   :  { %v614_v7 = vpop.permute.xlu1 %613  ;;  %v622_v44 = vpop.permute.xlu0 %621 }
 0x49e   :  { %674 = vst [vmem:[#allocation5 + $0x20] sm:$0xff] %v614_v7  ;;  %675 = vst [vmem:[#allocation5 + $0x28] sm:$0xff] %v614_v7 }
 0x49f   :  { %678 = vst [vmem:[#allocation5 + $0x40] sm:$0xff] %v622_v44  ;;  %679 = vst [vmem:[#allocation5 + $0x48] sm:$0xff] %v622_v44 }
 0x4a1   :  { %v618_v45 = vpop.permute.xlu1 %617  ;;  %v630_v46 = vpop.permute.xlu0 %629 }
 0x4a2   :  { %676 = vst [vmem:[#allocation5 + $0x30] sm:$0xff] %v618_v45  ;;  %677 = vst [vmem:[#allocation5 + $0x38] sm:$0xff] %v618_v45 }
 0x4a3   :  { %682 = vst [vmem:[#allocation5 + $0x60] sm:$0xff] %v630_v46  ;;  %683 = vst [vmem:[#allocation5 + $0x68] sm:$0xff] %v630_v46 }
 0x4a5   :  { %v626_v47 = vpop.permute.xlu1 %625  ;;  %v641_v48 = vpop.permute.xlu0 %640 }
 0x4a6   :  { %680 = vst [vmem:[#allocation5 + $0x50] sm:$0xff] %v626_v47  ;;  %681 = vst [vmem:[#allocation5 + $0x58] sm:$0xff] %v626_v47 }
 0x4a7   :  { %686 = vst [vmem:[#allocation5 + $0x80] sm:$0xff] %v641_v48  ;;  %687 = vst [vmem:[#allocation5 + $0x88] sm:$0xff] %v641_v48 }
 0x4a9   :  { %v634_v49 = vpop.permute.xlu1 %633  ;;  %v649_v50 = vpop.permute.xlu0 %648 }
 0x4aa   :  { %684 = vst [vmem:[#allocation5 + $0x70] sm:$0xff] %v634_v49  ;;  %685 = vst [vmem:[#allocation5 + $0x78] sm:$0xff] %v634_v49 }
 0x4ab   :  { %690 = vst [vmem:[#allocation5 + $0xa0] sm:$0xff] %v649_v50  ;;  %691 = vst [vmem:[#allocation5 + $0xa8] sm:$0xff] %v649_v50 }
 0x4ad   :  { %v645_v51 = vpop.permute.xlu1 %644  ;;  %v657_v52 = vpop.permute.xlu0 %656 }
 0x4ae   :  { %688 = vst [vmem:[#allocation5 + $0x90] sm:$0xff] %v645_v51  ;;  %689 = vst [vmem:[#allocation5 + $0x98] sm:$0xff] %v645_v51 }
 0x4af   :  { %694 = vst [vmem:[#allocation5 + $0xc0] sm:$0xff] %v657_v52  ;;  %695 = vst [vmem:[#allocation5 + $0xc8] sm:$0xff] %v657_v52 }
 0x4b1   :  { %v653_v53 = vpop.permute.xlu1 %652  ;;  %v665_v54 = vpop.permute.xlu0 %664 }
 0x4b2   :  { %692 = vst [vmem:[#allocation5 + $0xb0] sm:$0xff] %v653_v53  ;;  %693 = vst [vmem:[#allocation5 + $0xb8] sm:$0xff] %v653_v53 }
 0x4b3   :  { %698 = vst [vmem:[#allocation5 + $0xe0] sm:$0xff] %v665_v54  ;;  %699 = vst [vmem:[#allocation5 + $0xe8] sm:$0xff] %v665_v54 }
 0x4b5   :  { %v661_v55 = vpop.permute.xlu1 %660 }
 0x4b6   :  { %696 = vst [vmem:[#allocation5 + $0xd0] sm:$0xff] %v661_v55  ;;  %697 = vst [vmem:[#allocation5 + $0xd8] sm:$0xff] %v661_v55 }
 0x4b9   :  { %v669_v56 = vpop.permute.xlu1 %668 }
 0x4ba   :  { %700 = vst [vmem:[#allocation5 + $0xf0] sm:$0xff] %v669_v56  ;;  %701 = vst [vmem:[#allocation5 + $0xf8] sm:$0xff] %v669_v56 }
 0x4bb   :  { %831 = shalt.err (!%p828_p12)
}
 0x4bc   :  { %s832_s29 = scalar_lea.hbm %s1028_s9, 4096 }
 0x4bd   :  { %p833_p13 = scmp.ne.s32.totalorder %s1028_s9, %s832_s29  ;;  %p836_p0 = scmp.lt.u32.totalorder %s832_s29, %s1028_s9 }
 0x4bf   :  { %p838_p1 = pnand %p836_p0, %p833_p13 }
 0x4c1   :  { %841 = shalt.err (!%p838_p1)
}
 0x4c2   :  { %713 = dma.vmem_to_hbm [thread:$0]  %s708_s7, 4096, %s1028_s9, [#allocation4], %s847_s19, %s847_s19, %s848_s20  }
 0x4c3   :  { %844 = dma.done.wait [#allocation4], 4096  }
 0x4c4   :  { %845 = vsyncadd [#allocation4], 4294963200 }
 0x4c5   :  { %717 = vsyncpa [#allocation3], 1 }
 0x4c6   :  { %718 = vsyncpa [#allocation4], 1 }

</bundles_post_ra>
